<compile_context>
chip_gen: v6e
topology: v6e:2x2x1
jax: 0.10.0
libtpu: 0.0.40
codegen_flags: <defaults>
</compile_context>

<pallas_src>
import functools

import jax
import jax.numpy as jnp
from jax.experimental import pallas as pl
from jax.experimental.pallas import tpu as pltpu


# --------------------------------------------------------------------------------------
# Fused kernel: per-grid-step (one block of `batch_block` rows)
#   1) score_c[l] = (E[:, c*128+l] . w) / S        (VPU mult + sublane reduce, lane-dense)
#   2) acc[b, l] += score_c[l]  whenever tok[b, s] == c*128 + l   (compare/select lookup)
#   3) logit[b]  = sum_l acc[b, l]  (+ bias);  out = sigmoid(logit)
# --------------------------------------------------------------------------------------
def _fused_kernel(tok_ref, emb_t_ref, w_ref, b_ref, out_ref, *, inv_seq_len):
    # tok_ref:   (B_blk, S)  int32  -- batch on sublanes, native token layout
    # emb_t_ref: (D, V_pad)  f32    -- embedding transposed, vocab padded to 128*k (resident)
    # w_ref:     (D, 1)      f32    -- classifier weight as a column
    # b_ref:     (1, 1)      f32    -- classifier bias
    # out_ref:   (B_blk, 1)  f32
    blk_b, seq_len = tok_ref.shape
    _, v_pad = emb_t_ref.shape
    num_chunks = v_pad // 128

    tok = tok_ref[...]                                                # (B_blk, S) int32
    w_col = w_ref[...]                                                # (D, 1)
    lane_iota = jax.lax.broadcasted_iota(jnp.int32, (blk_b, 128), 1)  # vocab-lane ids

    logit = jnp.zeros((blk_b, 1), jnp.float32)
    for c in range(num_chunks):          # static; per-chunk working set is O(1) vregs in V
        # ---- lane-dense score for this 128-wide vocab chunk: (1, 128) ----
        emb_c = emb_t_ref[:, c * 128:(c + 1) * 128]                   # (D, 128) static slice
        score_c = jnp.sum(emb_c * w_col, axis=0, keepdims=True) * inv_seq_len
        score_b = jnp.broadcast_to(score_c, (blk_b, 128))             # hoisted broadcasts
        vid = lane_iota + c * 128

        # ---- lookup: acc[b, l] accumulates score[l] each time tok[b, s] == c*128 + l ----
        # TODO(synk): replace with a true dynamic gather for production-sized V.
        acc = jnp.zeros((blk_b, 128), jnp.float32)
        for s in range(seq_len):                                      # S is small & static here
            tok_s = jnp.broadcast_to(tok[:, s:s + 1], (blk_b, 128))   # (B_blk, 128) int32
            acc = acc + jnp.where(vid == tok_s, score_b, 0.0)
        logit = logit + jnp.sum(acc, axis=1, keepdims=True)           # lane reduce (XLU)

    logit = logit + b_ref[...]                                        # bias added once
    out_ref[...] = jax.nn.sigmoid(logit)                              # exp + recip on EUP


# --------------------------------------------------------------------------------------
# Wrapper
# --------------------------------------------------------------------------------------
def mymodel_forward(tokens, embedding, weight, bias, *, batch_block=8):
    """tokens: (B, S) int; embedding: (V, D) f32; weight: (1, D) f32 (PyTorch layout); bias: (1,) f32."""
    tokens = tokens.astype(jnp.int32)
    B, S = tokens.shape
    V, D = embedding.shape

    # One-time PARAMETER prep (layout only; hoist to weight-load time in production):
    # transpose the embedding and pad the vocab axis to a multiple of 128 lanes so the score
    # table comes out lane-dense with no in-kernel relayout.  Padded columns are zero, and the
    # padded vocab ids never occur in the tokens.
    V_pad = pl.cdiv(V, 128) * 128
    emb_t = jnp.zeros((D, V_pad), jnp.float32).at[:, :V].set(embedding.T.astype(jnp.float32))
    w_col = weight.astype(jnp.float32).reshape(1, D).T                # (D, 1)
    b_mat = bias.astype(jnp.float32).reshape(1, 1)                    # (1, 1)

    # Tokens stay (B, S): no transpose, no 128-lane pad.  Only pad B up to a sublane multiple
    # (no-op when B % batch_block == 0); padded rows produce garbage logits sliced off below.
    B_pad = pl.cdiv(B, batch_block) * batch_block
    tok = tokens if B_pad == B else jnp.pad(tokens, ((0, B_pad - B), (0, 0)))

    out = pl.pallas_call(
        functools.partial(_fused_kernel, inv_seq_len=1.0 / S),
        out_shape=jax.ShapeDtypeStruct((B_pad, 1), jnp.float32),
        grid=(B_pad // batch_block,),
        in_specs=[
            pl.BlockSpec((batch_block, S), lambda i: (i, 0)),         # token block, native layout
            pl.BlockSpec((D, V_pad), lambda i: (0, 0)),               # resident, fetched once
            pl.BlockSpec((D, 1), lambda i: (0, 0)),
            pl.BlockSpec((1, 1), lambda i: (0, 0)),
        ],
        out_specs=pl.BlockSpec((batch_block, 1), lambda i: (i, 0)),
        compiler_params=pltpu.CompilerParams(dimension_semantics=("parallel",)),
    )(tok, emb_t, w_col, b_mat)

    return out[:B]                                                    # (B, 1)


# --------------------------------------------------------------------------------------
# Pure-JAX reference matching the PyTorch semantics
# --------------------------------------------------------------------------------------
def reference_forward(tokens, embedding, weight, bias):
    emb = jnp.take(embedding, tokens, axis=0)        # (B, S, D)
    pooled = emb.mean(axis=1)                        # (B, D)  == AvgPool1d(S) on (B, D, S)
    logits = pooled @ weight.T + bias                # (B, 1)
    return jax.nn.sigmoid(logits)


if __name__ == "__main__":
    vocab_dim = 32
    vector_dim = 50
    sentence_length = 8
    batch = 2

    key = jax.random.PRNGKey(0)
    k_emb, k_w, k_b, k_tok = jax.random.split(key, 4)

    # deterministic parameter init (nn.Embedding ~ N(0,1); nn.Linear ~ U(-1/sqrt(D), 1/sqrt(D)))
    embedding = jax.random.normal(k_emb, (vocab_dim, vector_dim), dtype=jnp.float32)
    bound = 1.0 / (vector_dim ** 0.5)
    weight = jax.random.uniform(k_w, (1, vector_dim), minval=-bound, maxval=bound,
                                dtype=jnp.float32)
    bias = jax.random.uniform(k_b, (1,), minval=-bound, maxval=bound, dtype=jnp.float32)

    tokens = jax.random.randint(k_tok, (batch, sentence_length), 0, vocab_dim,
                                dtype=jnp.int32)

    out = jax.jit(mymodel_forward)(tokens, embedding, weight, bias)
    out = jax.block_until_ready(out)

    ref = reference_forward(tokens, embedding, weight, bias)
    assert out.shape == (batch, 1), out.shape
    assert jnp.allclose(out, ref, atol=1e-5, rtol=1e-5), (out, ref)

    print("KERNEL_OK")
</pallas_src>

<mosaic_0001>
module attributes {stable_mosaic.version = 11 : i64} {
  func.func @_fused_kernel(%arg0: i32, %arg1: memref<8x8xi32, #tpu.memory_space<vmem>>, %arg2: memref<50x128xf32, #tpu.memory_space<vmem>>, %arg3: memref<50x1xf32, #tpu.memory_space<vmem>>, %arg4: memref<1x1xf32, #tpu.memory_space<vmem>>, %arg5: memref<8x1xf32, #tpu.memory_space<vmem>>) attributes {dimension_semantics = [#tpu.dimension_semantics<parallel>], iteration_bounds = array<i64: 1>, scalar_prefetch = 0 : i64, scratch_operands = 0 : i64, tpu.core_type = #tpu.core_type<tc>, window_params = [{transform_indices = @transform_0, window_bounds = array<i64: 8, 8>}, {pipeline_mode = #tpu.pipeline_mode<synchronous>, transform_indices = @transform_1, window_bounds = array<i64: 50, 128>}, {pipeline_mode = #tpu.pipeline_mode<synchronous>, transform_indices = @transform_2, window_bounds = array<i64: 50, 1>}, {pipeline_mode = #tpu.pipeline_mode<synchronous>, transform_indices = @transform_3, window_bounds = array<i64: 1, 1>}, {transform_indices = @transform_4, window_bounds = array<i64: 8, 1>}]} {
    %c0 = arith.constant 0 : index
    %c0_0 = arith.constant 0 : index
    %0 = vector.load %arg1[%c0, %c0_0] : memref<8x8xi32, #tpu.memory_space<vmem>>, vector<8x8xi32>
    %c0_1 = arith.constant 0 : index
    %c0_2 = arith.constant 0 : index
    %1 = vector.load %arg3[%c0_1, %c0_2] : memref<50x1xf32, #tpu.memory_space<vmem>>, vector<50x1xf32>
    %2 = tpu.iota {dimensions = array<i32: 1>} : vector<8x128xi32>
    %cst = arith.constant 0.000000e+00 : f32
    %3 = vector.broadcast %cst : f32 to vector<8x1xf32>
    %c0_3 = arith.constant 0 : index
    %c0_4 = arith.constant 0 : index
    %4 = vector.load %arg2[%c0_3, %c0_4] : memref<50x128xf32, #tpu.memory_space<vmem>>, vector<50x128xf32>
    %5 = vector.broadcast %1 : vector<50x1xf32> to vector<50x128xf32>
    %6 = arith.mulf %4, %5 : vector<50x128xf32>
    %cst_5 = arith.constant dense<0.000000e+00> : vector<128xf32>
    %7 = vector.multi_reduction <add>, %6, %cst_5 [0] : vector<50x128xf32> to vector<128xf32>
    %8 = vector.shape_cast %7 : vector<128xf32> to vector<1x128xf32>
    %cst_6 = arith.constant 1.250000e-01 : f32
    %9 = vector.broadcast %cst_6 : f32 to vector<1x128xf32>
    %10 = arith.mulf %8, %9 : vector<1x128xf32>
    %11 = vector.shape_cast %10 : vector<1x128xf32> to vector<1x128xf32>
    %12 = vector.broadcast %11 : vector<1x128xf32> to vector<8x128xf32>
    %c0_i32 = arith.constant 0 : i32
    %13 = vector.broadcast %c0_i32 : i32 to vector<8x128xi32>
    %14 = arith.addi %2, %13 : vector<8x128xi32>
    %cst_7 = arith.constant 0.000000e+00 : f32
    %15 = vector.broadcast %cst_7 : f32 to vector<8x128xf32>
    %16 = vector.extract_strided_slice %0 {offsets = [0, 0], sizes = [8, 1], strides = [1, 1]} : vector<8x8xi32> to vector<8x1xi32>
    %17 = vector.shape_cast %16 : vector<8x1xi32> to vector<8x1xi32>
    %18 = vector.broadcast %17 : vector<8x1xi32> to vector<8x128xi32>
    %19 = arith.cmpi eq, %14, %18 : vector<8x128xi32>
    %cst_8 = arith.constant 0.000000e+00 : f32
    %20 = vector.broadcast %cst_8 : f32 to vector<8x128xf32>
    %21 = arith.select %19, %12, %20 : vector<8x128xi1>, vector<8x128xf32>
    %22 = arith.addf %15, %21 : vector<8x128xf32>
    %23 = vector.extract_strided_slice %0 {offsets = [0, 1], sizes = [8, 1], strides = [1, 1]} : vector<8x8xi32> to vector<8x1xi32>
    %24 = vector.shape_cast %23 : vector<8x1xi32> to vector<8x1xi32>
    %25 = vector.broadcast %24 : vector<8x1xi32> to vector<8x128xi32>
    %26 = arith.cmpi eq, %14, %25 : vector<8x128xi32>
    %cst_9 = arith.constant 0.000000e+00 : f32
    %27 = vector.broadcast %cst_9 : f32 to vector<8x128xf32>
    %28 = arith.select %26, %12, %27 : vector<8x128xi1>, vector<8x128xf32>
    %29 = arith.addf %22, %28 : vector<8x128xf32>
    %30 = vector.extract_strided_slice %0 {offsets = [0, 2], sizes = [8, 1], strides = [1, 1]} : vector<8x8xi32> to vector<8x1xi32>
    %31 = vector.shape_cast %30 : vector<8x1xi32> to vector<8x1xi32>
    %32 = vector.broadcast %31 : vector<8x1xi32> to vector<8x128xi32>
    %33 = arith.cmpi eq, %14, %32 : vector<8x128xi32>
    %cst_10 = arith.constant 0.000000e+00 : f32
    %34 = vector.broadcast %cst_10 : f32 to vector<8x128xf32>
    %35 = arith.select %33, %12, %34 : vector<8x128xi1>, vector<8x128xf32>
    %36 = arith.addf %29, %35 : vector<8x128xf32>
    %37 = vector.extract_strided_slice %0 {offsets = [0, 3], sizes = [8, 1], strides = [1, 1]} : vector<8x8xi32> to vector<8x1xi32>
    %38 = vector.shape_cast %37 : vector<8x1xi32> to vector<8x1xi32>
    %39 = vector.broadcast %38 : vector<8x1xi32> to vector<8x128xi32>
    %40 = arith.cmpi eq, %14, %39 : vector<8x128xi32>
    %cst_11 = arith.constant 0.000000e+00 : f32
    %41 = vector.broadcast %cst_11 : f32 to vector<8x128xf32>
    %42 = arith.select %40, %12, %41 : vector<8x128xi1>, vector<8x128xf32>
    %43 = arith.addf %36, %42 : vector<8x128xf32>
    %44 = vector.extract_strided_slice %0 {offsets = [0, 4], sizes = [8, 1], strides = [1, 1]} : vector<8x8xi32> to vector<8x1xi32>
    %45 = vector.shape_cast %44 : vector<8x1xi32> to vector<8x1xi32>
    %46 = vector.broadcast %45 : vector<8x1xi32> to vector<8x128xi32>
    %47 = arith.cmpi eq, %14, %46 : vector<8x128xi32>
    %cst_12 = arith.constant 0.000000e+00 : f32
    %48 = vector.broadcast %cst_12 : f32 to vector<8x128xf32>
    %49 = arith.select %47, %12, %48 : vector<8x128xi1>, vector<8x128xf32>
    %50 = arith.addf %43, %49 : vector<8x128xf32>
    %51 = vector.extract_strided_slice %0 {offsets = [0, 5], sizes = [8, 1], strides = [1, 1]} : vector<8x8xi32> to vector<8x1xi32>
    %52 = vector.shape_cast %51 : vector<8x1xi32> to vector<8x1xi32>
    %53 = vector.broadcast %52 : vector<8x1xi32> to vector<8x128xi32>
    %54 = arith.cmpi eq, %14, %53 : vector<8x128xi32>
    %cst_13 = arith.constant 0.000000e+00 : f32
    %55 = vector.broadcast %cst_13 : f32 to vector<8x128xf32>
    %56 = arith.select %54, %12, %55 : vector<8x128xi1>, vector<8x128xf32>
    %57 = arith.addf %50, %56 : vector<8x128xf32>
    %58 = vector.extract_strided_slice %0 {offsets = [0, 6], sizes = [8, 1], strides = [1, 1]} : vector<8x8xi32> to vector<8x1xi32>
    %59 = vector.shape_cast %58 : vector<8x1xi32> to vector<8x1xi32>
    %60 = vector.broadcast %59 : vector<8x1xi32> to vector<8x128xi32>
    %61 = arith.cmpi eq, %14, %60 : vector<8x128xi32>
    %cst_14 = arith.constant 0.000000e+00 : f32
    %62 = vector.broadcast %cst_14 : f32 to vector<8x128xf32>
    %63 = arith.select %61, %12, %62 : vector<8x128xi1>, vector<8x128xf32>
    %64 = arith.addf %57, %63 : vector<8x128xf32>
    %65 = vector.extract_strided_slice %0 {offsets = [0, 7], sizes = [8, 1], strides = [1, 1]} : vector<8x8xi32> to vector<8x1xi32>
    %66 = vector.shape_cast %65 : vector<8x1xi32> to vector<8x1xi32>
    %67 = vector.broadcast %66 : vector<8x1xi32> to vector<8x128xi32>
    %68 = arith.cmpi eq, %14, %67 : vector<8x128xi32>
    %cst_15 = arith.constant 0.000000e+00 : f32
    %69 = vector.broadcast %cst_15 : f32 to vector<8x128xf32>
    %70 = arith.select %68, %12, %69 : vector<8x128xi1>, vector<8x128xf32>
    %71 = arith.addf %64, %70 : vector<8x128xf32>
    %cst_16 = arith.constant dense<0.000000e+00> : vector<8xf32>
    %72 = vector.multi_reduction <add>, %71, %cst_16 [1] : vector<8x128xf32> to vector<8xf32>
    %73 = vector.shape_cast %72 : vector<8xf32> to vector<8x1xf32>
    %74 = arith.addf %3, %73 : vector<8x1xf32>
    %c0_17 = arith.constant 0 : index
    %c0_18 = arith.constant 0 : index
    %75 = vector.load %arg4[%c0_17, %c0_18] : memref<1x1xf32, #tpu.memory_space<vmem>>, vector<1x1xf32>
    %76 = vector.broadcast %75 : vector<1x1xf32> to vector<8x1xf32>
    %77 = arith.addf %74, %76 : vector<8x1xf32>
    %78 = arith.negf %77 : vector<8x1xf32>
    %79 = math.exp %78 : vector<8x1xf32>
    %cst_19 = arith.constant 1.000000e+00 : f32
    %80 = vector.broadcast %cst_19 : f32 to vector<8x1xf32>
    %81 = arith.addf %80, %79 : vector<8x1xf32>
    %82 = arith.divf %80, %81 : vector<8x1xf32>
    %c0_20 = arith.constant 0 : index
    %c0_21 = arith.constant 0 : index
    %83 = vector.load %arg5[%c0_20, %c0_21] : memref<8x1xf32, #tpu.memory_space<vmem>>, vector<8x1xf32>
    tpu.vector_store %arg5[%c0_20, %c0_21], %82 {strides = array<i32>} : memref<8x1xf32, #tpu.memory_space<vmem>>, vector<8x1xf32>,
    return
  }
  func.func @transform_0(%arg0: i32) -> (i32, i32) {
    %c0_i32 = arith.constant 0 : i32
    %c0_i32_0 = arith.constant 0 : i32
    return %arg0, %c0_i32 : i32, i32
  }
  func.func @transform_1(%arg0: i32) -> (i32, i32) {
    %c0_i32 = arith.constant 0 : i32
    %c0_i32_0 = arith.constant 0 : i32
    %c0_i32_1 = arith.constant 0 : i32
    return %c0_i32, %c0_i32_0 : i32, i32
  }
  func.func @transform_2(%arg0: i32) -> (i32, i32) {
    %c0_i32 = arith.constant 0 : i32
    %c0_i32_0 = arith.constant 0 : i32
    %c0_i32_1 = arith.constant 0 : i32
    return %c0_i32, %c0_i32_0 : i32, i32
  }
  func.func @transform_3(%arg0: i32) -> (i32, i32) {
    %c0_i32 = arith.constant 0 : i32
    %c0_i32_0 = arith.constant 0 : i32
    %c0_i32_1 = arith.constant 0 : i32
    return %c0_i32, %c0_i32_0 : i32, i32
  }
  func.func @transform_4(%arg0: i32) -> (i32, i32) {
    %c0_i32 = arith.constant 0 : i32
    %c0_i32_0 = arith.constant 0 : i32
    return %arg0, %c0_i32 : i32, i32
  }
}

</mosaic_0001>

<bundles_post_ra>
// kernel: mymodel_forward.1
= control target key start
LH: loop header
LB: loop body
LE: loop exit
PB: predicated region body
PF: predicated region fallthrough
CT: control target
= control target key end

     0   :  { %v187_v0 = vmov 0   ;;  %v188_v9 = vmov 2   ;;  %v189_v10 = vmov 1   ;;  %v190_v11 = vmov 3   ;;  %s271_s2 = inlined_call_operand.vmem [shape: f32[50,1], index: 2, kind: input, shape index: {}]   ;;  %s272_s0 = inlined_call_operand.vmem [shape: s32[8,8], index: 0, kind: input, shape index: {}]   ;;  %s273_s3 = inlined_call_operand.<no memory space> [shape: f32[1,1], index: 3, kind: input, shape index: {}]   ;;  %s274_s1 = inlined_call_operand.vmem [shape: f32[50,128], index: 1, kind: input, shape index: {}]   ;;  %s275_s4 = inlined_call_operand.vmem [shape: f32[8,1], index: 4, kind: output, shape index: {}]  }
   0x1   :  { %175 = vset.pattern.permute.xlu1 %v187_v0  ;;  %174 = vset.pattern.permute.xlu0 %v187_v0  ;;  %v22_v1 = vld [vmem:[%s271_s2 + $0x10] sm:$0xff]  ;;  %v20_v2 = vld [vmem:[%s271_s2] sm:$0xff]  ;;  %v23_v3 = vld [vmem:[%s271_s2 + $0x18] sm:$0xff]  ;;  %v191_v12 = vmov 4   ;;  %v192_v13 = vmov 5   ;;  %v193_v14 = vmov 7   ;;  %v9_v16 = vstv %s273_s3 }
   0x2   :  { %48 = vperm.xlu1 %175, %v22_v1   ;;  %38 = vperm.xlu0 %174, %v20_v2   ;;  %v21_v4 = vld [vmem:[%s271_s2 + $0x8] sm:$0xff]  ;;  %v24_v6 = vld [vmem:[%s271_s2 + $0x20] sm:$0xff]  ;;  %v26_v7 = vld [vmem:[%s271_s2 + $0x30] sm:$0x3]  ;;  %v194_v15 = vmov 6   ;;  %vm83_vm0 = vcmask 1041408   ;;  %v27_v50 = vlaneseq }
   0x3   :  { %v25_v5 = vld [vmem:[%s271_s2 + $0x28] sm:$0xff]  ;;  %v19_v8 = vld [vmem:[%s272_s0] sm:$0xff]  ;;  %10 = vst [vmem:[#allocation2] sm:$0x1] %v9_v16  ;;  %v31_v21 = vld [vmem:[%s274_s1 + $0x10] sm:$0xff]  ;;  %vm158_vm9 = vcmask 7168  }
   0x4   :  { %v29_v19 = vld [vmem:[%s274_s1] sm:$0xff]  ;;  %v30_v20 = vld [vmem:[%s274_s1 + $0x8] sm:$0xff]  ;;  %v32_v26 = vld [vmem:[%s274_s1 + $0x18] sm:$0xff]  ;;  %v28_v55 = vand.u32 127, %v27_v50 }
   0x5   :  { %v33_v30 = vld [vmem:[%s274_s1 + $0x20] sm:$0xff]  ;;  %v34_v34 = vld [vmem:[%s274_s1 + $0x28] sm:$0xff]  ;;  %v35_v35 = vld [vmem:[%s274_s1 + $0x30] sm:$0x3] }
   0x6   :  { %53 = vperm.xlu1 %175, %v23_v3   ;;  %43 = vperm.xlu0 %174, %v21_v4  }
   0xa   :  { %63 = vperm.xlu1 %175, %v25_v5   ;;  %58 = vperm.xlu0 %174, %v24_v6  }
   0xe   :  { %68 = vperm.xlu0 %174, %v26_v7   ;;  %94 = vperm.xlu1 %175, %v19_v8  }
  0x12   :  { %177 = vset.pattern.permute.xlu1 %v188_v9  ;;  %176 = vset.pattern.permute.xlu0 %v189_v10 }
  0x13   :  { %106 = vperm.xlu1 %177, %v19_v8   ;;  %100 = vperm.xlu0 %176, %v19_v8  }
  0x17   :  { %178 = vset.pattern.permute.xlu1 %v190_v11  ;;  %179 = vset.pattern.permute.xlu0 %v191_v12 }
  0x18   :  { %112 = vperm.xlu1 %178, %v19_v8   ;;  %118 = vperm.xlu0 %179, %v19_v8  }
  0x1c   :  { %180 = vset.pattern.permute.xlu1 %v192_v13  ;;  %182 = vset.pattern.permute.xlu0 %v193_v14  ;;  %v164_v13 = vld [vmem:[#allocation2] ss:$0 sm:$0xff] }
  0x1d   :  { %124 = vperm.xlu1 %180, %v19_v8   ;;  %136 = vperm.xlu0 %182, %v19_v8  }
  0x21   :  { %181 = vset.pattern.permute.xlu1 %v194_v15 }
  0x22   :  { %130 = vperm.xlu1 %181, %v19_v8  }
  0x7d   :  { %v49_v17 = vpop.permute.xlu1 %48  ;;  %v39_v18 = vpop.permute.xlu0 %38 }
  0x7e   :  { %v71_v24 = vmul.f32 %v39_v18, %v29_v19  ;;  %v73_v27 = vmul.f32 %v49_v17, %v31_v21 }
  0x81   :  { %v54_v22 = vpop.permute.xlu1 %53  ;;  %v44_v23 = vpop.permute.xlu0 %43 }
  0x82   :  { %v72_v25 = vmul.f32 %v44_v23, %v30_v20  ;;  %v74_v31 = vmul.f32 %v54_v22, %v32_v26 }
  0x84   :  { %v78_v28 = vadd.f32 %v72_v25, %v71_v24 }
  0x85   :  { %v59_v29 = vpop.permute.xlu0 %58  ;;  %v64_v33 = vpop.permute.xlu1 %63 }
  0x86   :  { %v79_v32 = vadd.f32 %v78_v28, %v73_v27  ;;  %v75_v36 = vmul.f32 %v59_v29, %v33_v30  ;;  %v76_v39 = vmul.f32 %v64_v33, %v34_v34 }
  0x88   :  { %v80_v37 = vadd.f32 %v79_v32, %v74_v31 }
  0x89   :  { %v69_v38 = vpop.permute.xlu0 %68  ;;  %v95_v44 = vpop.permute.xlu1 %94 }
  0x8a   :  { %v81_v40 = vadd.f32 %v80_v37, %v75_v36  ;;  %v77_v41 = vmul.f32 %v69_v38, %v35_v35  ;;  %vm96_vm2 = vcmp.eq.s32.totalorder %v28_v55, %v95_v44 }
  0x8c   :  { %v82_v42 = vadd.f32 %v81_v40, %v76_v39  ;;  %v84_v43 = vsel %vm83_vm0, %v77_v41, 0.0 }
  0x8e   :  { %v85_v45 = vadd.f32 %v84_v43, %v82_v42  ;;  %v107_v47 = vpop.permute.xlu1 %106  ;;  %v101_v54 = vpop.permute.xlu0 %100 }
  0x8f   :  { %vm102_vm1 = vcmp.eq.s32.totalorder %v28_v55, %v101_v54  ;;  %vm108_vm3 = vcmp.eq.s32.totalorder %v28_v55, %v107_v47 }
  0x90   :  { %v86_v46 = vrot.slane %v85_v45, 4 }
  0x92   :  { %v87_v48 = vadd.f32 %v86_v46, %v85_v45 }
  0x93   :  { %v113_v52 = vpop.permute.xlu1 %112  ;;  %v119_v61 = vpop.permute.xlu0 %118 }
  0x94   :  { %v88_v49 = vrot.slane %v87_v48, 2  ;;  %vm114_vm4 = vcmp.eq.s32.totalorder %v28_v55, %v113_v52  ;;  %vm120_vm5 = vcmp.eq.s32.totalorder %v28_v55, %v119_v61 }
  0x96   :  { %v89_v51 = vadd.f32 %v88_v49, %v87_v48 }
  0x98   :  { %v90_v53 = vrot.slane %v89_v51, 1  ;;  %v125_v58 = vpop.permute.xlu1 %124  ;;  %v137_v5 = vpop.permute.xlu0 %136 }
  0x99   :  { %vm126_vm6 = vcmp.eq.s32.totalorder %v28_v55, %v125_v58  ;;  %vm138_vm8 = vcmp.eq.s32.totalorder %v28_v55, %v137_v5 }
  0x9a   :  { %v91_v56 = vadd.f32 %v90_v53, %v89_v51 }
  0x9c   :  { %v92_v57 = vmul.f32 0.125, %v91_v56 }
  0x9d   :  { %v131_v2 = vpop.permute.xlu1 %130 }
  0x9e   :  { %v97_v59 = vsel %vm96_vm2, %v92_v57, 0.0  ;;  %v103_v60 = vsel %vm102_vm1, %v92_v57, 0.0  ;;  %v109_v63 = vsel %vm108_vm3, %v92_v57, 0.0  ;;  %v115_v1 = vsel %vm114_vm4, %v92_v57, 0.0 }
  0x9f   :  { %v104_v62 = vadd.f32 %v103_v60, %v97_v59  ;;  %v121_v4 = vsel %vm120_vm5, %v92_v57, 0.0  ;;  %vm132_vm7 = vcmp.eq.s32.totalorder %v28_v55, %v131_v2  ;;  %v127_v7 = vsel %vm126_vm6, %v92_v57, 0.0 }
  0xa0   :  { %v133_v9 = vsel %vm132_vm7, %v92_v57, 0.0  ;;  %v139_v11 = vsel %vm138_vm8, %v92_v57, 0.0 }
  0xa1   :  { %v110_v0 = vadd.f32 %v109_v63, %v104_v62 }
  0xa3   :  { %v116_v3 = vadd.f32 %v115_v1, %v110_v0 }
  0xa5   :  { %v122_v6 = vadd.f32 %v121_v4, %v116_v3 }
  0xa7   :  { %v128_v8 = vadd.f32 %v127_v7, %v122_v6 }
  0xa9   :  { %v134_v10 = vadd.f32 %v133_v9, %v128_v8 }
  0xab   :  { %v140_v12 = vadd.f32 %v139_v11, %v134_v10 }
  0xad   :  { %141 = vadd.xlane.f32.xlu1 %v140_v12 }
 0x136   :  { %v142_v14 = vpop.xlane.xlu1 %141 }
 0x137   :  { %v151_v15 = vadd.f32 %v164_v13, %v142_v14 }
 0x139   :  { %v165_v16 = vmul.f32 -1.442695, %v151_v15 }
 0x13b   :  { %183 = vpow2.f32 %v165_v16 }
 0x148   :  { %v184_v17 = vpop.eup %183 }
 0x149   :  { %v155_v18 = vadd.f32 1.0, %v184_v17 }
 0x14b   :  { %185 = vrcp.f32 %v155_v18 }
 0x158   :  { %v186_v19 = vpop.eup %185 }
 0x159   :  { %159 = vst.msk [vmem:[%s275_s4] sm:$0xff] %vm158_vm9, %v186_v19 }

</bundles_post_ra>
